<compile_context>
chip_gen: v7x
topology: tpu7x:2x2x1
jax: 0.10.0
libtpu: 0.0.40
codegen_flags: <defaults>
</compile_context>

<pallas_src>
import functools

import jax
import jax.numpy as jnp
from jax.experimental import pallas as pl
from jax.experimental.pallas import tpu as pltpu


# ---------------------------------------------------------------------------
# helpers
# ---------------------------------------------------------------------------
def _round_up(x, m):
    return (x + m - 1) // m * m


def _choose_tm(m, target):
    """Row tile: whole array if it fits, otherwise `target` (multiple of 8)."""
    if m <= target:
        return m
    return max(8, (target // 8) * 8)


def _vmem_limit_bytes(block_shapes):
    """Explicit VMEM budget: double-buffered f32 blocks (sublane/lane padded)
    plus slack, clamped to stay well inside v7x's 64 MiB physical VMEM."""
    total = 0
    for rows, cols in block_shapes:
        total += 2 * _round_up(rows, 8) * _round_up(cols, 128) * 4
    total += 4 * 1024 * 1024
    return int(min(max(total, 32 * 1024 * 1024), 48 * 1024 * 1024))


# ---------------------------------------------------------------------------
# Kernel 1: fused (X @ W + b) -> ReLU, plus per-block partial column sum and
# sum-of-squares (for batch-norm statistics).  Fully parallel grid axis.
# ---------------------------------------------------------------------------
def _matmul_relu_stats_kernel(x_ref, w_ref, b_ref, y_ref, stat_ref, *, m_total):
    """stat block is (1, 8, C): row 0 = sum, row 1 = sum of squares, rows 2..7
    are zero padding (keeps the block (8, C)-tiled and the axis parallel)."""
    i = pl.program_id(0)
    tm = x_ref.shape[0]

    z = jnp.dot(x_ref[...], w_ref[...], preferred_element_type=jnp.float32)
    z = jnp.maximum(z + b_ref[...], 0.0)
    y_ref[...] = z

    # Mask rows past the true end of the array (ragged final block).
    row = i * tm + jax.lax.broadcasted_iota(jnp.int32, z.shape, 0)
    zm = jnp.where(row < m_total, z, 0.0)
    s = jnp.sum(zm, axis=0)
    q = jnp.sum(zm * zm, axis=0)

    ridx = jax.lax.broadcasted_iota(jnp.int32, stat_ref.shape, 1)
    stat_ref[...] = jnp.where(ridx == 0, s[None, None, :],
                              jnp.where(ridx == 1, q[None, None, :], 0.0))


def matmul_relu_stats(x, w, b, *, tm_target=1024):
    """relu(x @ w + b) with fused per-channel partial batch statistics.

    Returns (y, stats): y is (M, C); stats is (grid, 8, C) per-block partials
    (row 0 = column sums, row 1 = column sums of squares).
    """
    M, K = x.shape
    C = w.shape[1]
    tm = _choose_tm(M, tm_target)
    grid = pl.cdiv(M, tm)
    vmem = _vmem_limit_bytes([(tm, K), (K, C), (1, C), (tm, C), (8, C)])

    return pl.pallas_call(
        functools.partial(_matmul_relu_stats_kernel, m_total=M),
        out_shape=(
            jax.ShapeDtypeStruct((M, C), jnp.float32),
            jax.ShapeDtypeStruct((grid, 8, C), jnp.float32),
        ),
        grid_spec=pltpu.PrefetchScalarGridSpec(
            num_scalar_prefetch=0,
            grid=(grid,),
            in_specs=[
                pl.BlockSpec((tm, K), lambda i: (i, 0)),
                pl.BlockSpec((K, C), lambda i: (0, 0)),
                pl.BlockSpec((1, C), lambda i: (0, 0)),
            ],
            out_specs=[
                pl.BlockSpec((tm, C), lambda i: (i, 0)),
                pl.BlockSpec((1, 8, C), lambda i: (i, 0, 0)),
            ],
        ),
        compiler_params=pltpu.CompilerParams(
            dimension_semantics=("parallel",),
            vmem_limit_bytes=vmem),
    )(x, w, b.reshape(1, C))


# ---------------------------------------------------------------------------
# Kernel 2: fused channel-concat + batch-norm affine
#   out[:, :uo]   = yu * scale_u + shift_u
#   out[:, uo: ]  = ya * scale_a + shift_a
# ---------------------------------------------------------------------------
def _bn_affine_concat_kernel(yu_ref, ya_ref, scu_ref, shu_ref, sca_ref, sha_ref,
                             o_ref):
    uo = yu_ref.shape[1]
    ao = ya_ref.shape[1]
    o_ref[:, 0:uo] = yu_ref[...] * scu_ref[...] + shu_ref[...]
    o_ref[:, uo:uo + ao] = ya_ref[...] * sca_ref[...] + sha_ref[...]


def bn_affine_concat(yu, ya, scale_u, shift_u, scale_a, shift_a, *,
                     tm_target=1024):
    M, uo = yu.shape
    ao = ya.shape[1]
    C = uo + ao
    tm = _choose_tm(M, tm_target)
    grid = pl.cdiv(M, tm)
    vmem = _vmem_limit_bytes([(tm, uo), (tm, ao), (tm, C),
                              (1, uo), (1, uo), (1, ao), (1, ao)])

    return pl.pallas_call(
        _bn_affine_concat_kernel,
        out_shape=jax.ShapeDtypeStruct((M, C), jnp.float32),
        grid_spec=pltpu.PrefetchScalarGridSpec(
            num_scalar_prefetch=0,
            grid=(grid,),
            in_specs=[
                pl.BlockSpec((tm, uo), lambda i: (i, 0)),
                pl.BlockSpec((tm, ao), lambda i: (i, 0)),
                pl.BlockSpec((1, uo), lambda i: (0, 0)),
                pl.BlockSpec((1, uo), lambda i: (0, 0)),
                pl.BlockSpec((1, ao), lambda i: (0, 0)),
                pl.BlockSpec((1, ao), lambda i: (0, 0)),
            ],
            out_specs=pl.BlockSpec((tm, C), lambda i: (i, 0)),
        ),
        compiler_params=pltpu.CompilerParams(
            dimension_semantics=("parallel",),
            vmem_limit_bytes=vmem),
    )(yu, ya, scale_u.reshape(1, uo), shift_u.reshape(1, uo),
      scale_a.reshape(1, ao), shift_a.reshape(1, ao))


# ---------------------------------------------------------------------------
# UpBlock forward (NCHW in / NCHW out)
# ---------------------------------------------------------------------------
def up_block_forward(x_up, x_across, params, *, eps=1e-5, tm_target=1024):
    wt = params["conv_transpose_w"]   # (Cin, up_out, 2, 2)  PyTorch layout
    bt = params["conv_transpose_b"]   # (up_out,)
    wa = params["conv_across_w"]      # (across_out, Cac, 1, 1)
    ba = params["conv_across_b"]      # (across_out,)
    gamma = params["bn_w"]            # (Cout,)
    beta = params["bn_b"]             # (Cout,)

    N, Cin, Hs, Ws = x_up.shape
    _, Cac, H, W = x_across.shape
    up_out = wt.shape[1]
    across_out = wa.shape[0]
    C_out = up_out + across_out
    assert H == 2 * Hs and W == 2 * Ws
    M_up = N * Hs * Ws
    M = N * H * W

    # --- up path: ConvTranspose2d(k=2, s=2) as matmul into 4*up_out columns
    #     ordered (a, b, co); the result then reshapes row-major (free) into
    #     output-pixel order (n, hs, ws, a, b) -- no materialized pixel shuffle.
    xu = jnp.transpose(x_up, (0, 2, 3, 1)).reshape(M_up, Cin)
    wuf = jnp.transpose(wt, (0, 2, 3, 1)).reshape(Cin, 4 * up_out)
    buf = jnp.tile(bt, 4)
    yu4, st_u = matmul_relu_stats(xu, wuf, buf, tm_target=tm_target)
    yu = yu4.reshape(M, up_out)            # rows ordered (n, hs, ws, a, b)

    # --- across path: 1x1 Conv2d as matmul; rows in the same pixel order
    xa = jnp.transpose(x_across.reshape(N, Cac, Hs, 2, Ws, 2),
                       (0, 2, 4, 3, 5, 1)).reshape(M, Cac)
    waf = jnp.transpose(wa[:, :, 0, 0], (1, 0))       # (Cac, across_out)
    ya, st_a = matmul_relu_stats(xa, waf, ba, tm_target=tm_target)

    # --- BatchNorm2d (training-mode forward: batch stats, biased variance) ---
    # TODO(synk): running_mean/running_var buffer updates (training-time side
    # effect of nn.BatchNorm2d) are not produced, only the normalized output.
    su = st_u[:, 0, :].sum(axis=0).reshape(4, up_out).sum(axis=0)
    qu = st_u[:, 1, :].sum(axis=0).reshape(4, up_out).sum(axis=0)
    sa = st_a[:, 0, :].sum(axis=0)
    qa = st_a[:, 1, :].sum(axis=0)
    s = jnp.concatenate([su, sa])
    q = jnp.concatenate([qu, qa])
    mean = s / M
    var = jnp.maximum(q / M - mean * mean, 0.0)       # clamp vs. cancellation
    scale = gamma * jax.lax.rsqrt(var + eps)
    shift = beta - mean * scale

    # --- fused concat + BN affine (single pass over the activation) ---
    out2 = bn_affine_concat(yu, ya, scale[:up_out], shift[:up_out],
                            scale[up_out:], shift[up_out:], tm_target=tm_target)

    # rows of out2 are (n, hs, ws, a, b); one transpose produces NCHW and
    # absorbs the conv-transpose pixel shuffle at the same time.
    out = jnp.transpose(out2.reshape(N, Hs, Ws, 2, 2, C_out),
                        (0, 5, 1, 3, 2, 4)).reshape(N, C_out, H, W)
    return out


# ---------------------------------------------------------------------------
# Pure-JAX reference (NCHW, einsum-based) for correctness checking.
# ---------------------------------------------------------------------------
def up_block_reference(x_up, x_across, params, *, eps=1e-5):
    wt, bt = params["conv_transpose_w"], params["conv_transpose_b"]
    wa, ba = params["conv_across_w"], params["conv_across_b"]
    gamma, beta = params["bn_w"], params["bn_b"]
    N, Cin, Hs, Ws = x_up.shape
    up_out = wt.shape[1]
    hi = jnp.einsum("nchw,cdab->ndhawb", x_up, wt,
                    precision=jax.lax.Precision.HIGHEST)
    hi = hi.reshape(N, up_out, 2 * Hs, 2 * Ws) + bt[None, :, None, None]
    ac = jnp.einsum("nchw,dc->ndhw", x_across, wa[:, :, 0, 0],
                    precision=jax.lax.Precision.HIGHEST)
    ac = ac + ba[None, :, None, None]
    joint = jnp.concatenate([hi, ac], axis=1)
    r = jnp.maximum(joint, 0.0)
    mean = r.mean(axis=(0, 2, 3), keepdims=True)
    var = ((r - mean) ** 2).mean(axis=(0, 2, 3), keepdims=True)
    return ((r - mean) * jax.lax.rsqrt(var + eps)
            * gamma[None, :, None, None] + beta[None, :, None, None])


if __name__ == "__main__":
    # small shapes: batch=2, in_channels=4, across_channels=6, out_channels=8
    N, Cin, Cac, Cout = 2, 4, 6, 8
    up_out = across_out = Cout // 2
    Hs = Ws = 8                         # x_up spatial; output spatial = 16

    key = jax.random.PRNGKey(0)
    ks = jax.random.split(key, 10)
    x_up = jax.random.normal(ks[0], (N, Cin, Hs, Ws), jnp.float32)
    x_across = jax.random.normal(ks[1], (N, Cac, 2 * Hs, 2 * Ws), jnp.float32)

    params = {
        "conv_transpose_w": 0.2 * jax.random.normal(ks[2], (Cin, up_out, 2, 2), jnp.float32),
        "conv_transpose_b": 0.1 * jax.random.normal(ks[3], (up_out,), jnp.float32),
        "conv_across_w": 0.2 * jax.random.normal(ks[4], (across_out, Cac, 1, 1), jnp.float32),
        "conv_across_b": 0.1 * jax.random.normal(ks[5], (across_out,), jnp.float32),
        "bn_w": 1.0 + 0.1 * jax.random.normal(ks[6], (Cout,), jnp.float32),
        "bn_b": 0.1 * jax.random.normal(ks[7], (Cout,), jnp.float32),
    }

    ref = jax.block_until_ready(up_block_reference(x_up, x_across, params))

    # 1) default large-tile path
    out = jax.block_until_ready(up_block_forward(x_up, x_across, params))
    assert out.shape == (N, Cout, 2 * Hs, 2 * Ws), out.shape
    assert jnp.allclose(out, ref, atol=1e-2, rtol=1e-2), float(jnp.abs(out - ref).max())

    # 2) multi-block path (grid > 1: exercises the per-block partial statistics)
    out_mb = jax.block_until_ready(
        up_block_forward(x_up, x_across, params, tm_target=128))
    assert jnp.allclose(out_mb, ref, atol=1e-2, rtol=1e-2), float(jnp.abs(out_mb - ref).max())

    # 3) ragged path (row count not divisible by the tile) with odd spatial size
    Hs2 = Ws2 = 5
    x_up2 = jax.random.normal(ks[8], (N, Cin, Hs2, Ws2), jnp.float32)
    x_across2 = jax.random.normal(ks[9], (N, Cac, 2 * Hs2, 2 * Ws2), jnp.float32)
    ref2 = jax.block_until_ready(up_block_reference(x_up2, x_across2, params))
    out_rg = jax.block_until_ready(
        up_block_forward(x_up2, x_across2, params, tm_target=64))
    assert out_rg.shape == (N, Cout, 2 * Hs2, 2 * Ws2), out_rg.shape
    assert jnp.allclose(out_rg, ref2, atol=1e-2, rtol=1e-2), float(jnp.abs(out_rg - ref2).max())

    print("KERNEL_OK")
</pallas_src>

<mosaic_0001>
module attributes {stable_mosaic.version = 11 : i64} {
  func.func @_matmul_relu_stats_kernel(%arg0: i32, %arg1: memref<128x4xf32, #tpu.memory_space<vmem>>, %arg2: memref<4x16xf32, #tpu.memory_space<vmem>>, %arg3: memref<1x16xf32, #tpu.memory_space<vmem>>, %arg4: memref<128x16xf32, #tpu.memory_space<vmem>>, %arg5: memref<1x8x16xf32, #tpu.memory_space<vmem>>) attributes {dimension_semantics = [#tpu.dimension_semantics<parallel>], iteration_bounds = array<i64: 1>, scalar_prefetch = 0 : i64, scratch_operands = 0 : i64, tpu.core_type = #tpu.core_type<tc>, window_params = [{transform_indices = @transform_0, window_bounds = array<i64: 128, 4>}, {pipeline_mode = #tpu.pipeline_mode<synchronous>, transform_indices = @transform_1, window_bounds = array<i64: 4, 16>}, {pipeline_mode = #tpu.pipeline_mode<synchronous>, transform_indices = @transform_2, window_bounds = array<i64: 1, 16>}, {transform_indices = @transform_3, window_bounds = array<i64: 128, 16>}, {transform_indices = @transform_4, window_bounds = array<i64: 1, 8, 16>}]} {
    %c0 = arith.constant 0 : index
    %c0_0 = arith.constant 0 : index
    %0 = vector.load %arg1[%c0, %c0_0] : memref<128x4xf32, #tpu.memory_space<vmem>>, vector<128x4xf32>
    %c0_1 = arith.constant 0 : index
    %c0_2 = arith.constant 0 : index
    %1 = vector.load %arg2[%c0_1, %c0_2] : memref<4x16xf32, #tpu.memory_space<vmem>>, vector<4x16xf32>
    %cst = arith.constant dense<0.000000e+00> : vector<128x16xf32>
    %2 = tpu.matmul %0, %1, %cst {dimension_numbers = #tpu.dot_dimension_numbers<[1], [0], [0], [1], [0, 0, 1, 1], [], []>} : vector<128x4xf32>, vector<4x16xf32>, vector<128x16xf32> -> vector<128x16xf32>
    %c0_3 = arith.constant 0 : index
    %c0_4 = arith.constant 0 : index
    %3 = vector.load %arg3[%c0_3, %c0_4] : memref<1x16xf32, #tpu.memory_space<vmem>>, vector<1x16xf32>
    %4 = vector.broadcast %3 : vector<1x16xf32> to vector<128x16xf32>
    %5 = arith.addf %2, %4 : vector<128x16xf32>
    %cst_5 = arith.constant 0.000000e+00 : f32
    %6 = vector.broadcast %cst_5 : f32 to vector<128x16xf32>
    %7 = arith.maximumf %5, %6 : vector<128x16xf32>
    %c0_6 = arith.constant 0 : index
    %c0_7 = arith.constant 0 : index
    %8 = vector.load %arg4[%c0_6, %c0_7] : memref<128x16xf32, #tpu.memory_space<vmem>>, vector<128x16xf32>
    tpu.vector_store %arg4[%c0_6, %c0_7], %7 {strides = array<i32>} : memref<128x16xf32, #tpu.memory_space<vmem>>, vector<128x16xf32>,
    %c128_i32 = arith.constant 128 : i32
    %9 = arith.muli %arg0, %c128_i32 : i32
    %10 = tpu.iota {dimensions = array<i32: 0>} : vector<128x16xi32>
    %11 = vector.broadcast %9 : i32 to vector<128x16xi32>
    %12 = arith.addi %11, %10 : vector<128x16xi32>
    %c128_i32_8 = arith.constant 128 : i32
    %13 = vector.broadcast %c128_i32_8 : i32 to vector<128x16xi32>
    %14 = arith.cmpi slt, %12, %13 : vector<128x16xi32>
    %cst_9 = arith.constant 0.000000e+00 : f32
    %15 = vector.broadcast %cst_9 : f32 to vector<128x16xf32>
    %16 = arith.select %14, %7, %15 : vector<128x16xi1>, vector<128x16xf32>
    %cst_10 = arith.constant dense<0.000000e+00> : vector<16xf32>
    %17 = vector.multi_reduction <add>, %16, %cst_10 [0] : vector<128x16xf32> to vector<16xf32>
    %18 = arith.mulf %16, %16 : vector<128x16xf32>
    %cst_11 = arith.constant dense<0.000000e+00> : vector<16xf32>
    %19 = vector.multi_reduction <add>, %18, %cst_11 [0] : vector<128x16xf32> to vector<16xf32>
    %20 = tpu.iota {dimensions = array<i32: 1>} : vector<1x8x16xi32>
    %c0_i32 = arith.constant 0 : i32
    %21 = vector.broadcast %c0_i32 : i32 to vector<1x8x16xi32>
    %22 = arith.cmpi eq, %20, %21 : vector<1x8x16xi32>
    %23 = vector.shape_cast %17 : vector<16xf32> to vector<1x1x16xf32>
    %c1_i32 = arith.constant 1 : i32
    %24 = vector.broadcast %c1_i32 : i32 to vector<1x8x16xi32>
    %25 = arith.cmpi eq, %20, %24 : vector<1x8x16xi32>
    %26 = vector.shape_cast %19 : vector<16xf32> to vector<1x1x16xf32>
    %cst_12 = arith.constant 0.000000e+00 : f32
    %27 = vector.shape_cast %26 : vector<1x1x16xf32> to vector<1x1x16xf32>
    %28 = vector.broadcast %27 : vector<1x1x16xf32> to vector<1x8x16xf32>
    %29 = vector.broadcast %cst_12 : f32 to vector<1x8x16xf32>
    %30 = arith.select %25, %28, %29 : vector<1x8x16xi1>, vector<1x8x16xf32>
    %31 = vector.shape_cast %23 : vector<1x1x16xf32> to vector<1x1x16xf32>
    %32 = vector.broadcast %31 : vector<1x1x16xf32> to vector<1x8x16xf32>
    %33 = arith.select %22, %32, %30 : vector<1x8x16xi1>, vector<1x8x16xf32>
    %c0_13 = arith.constant 0 : index
    %c0_14 = arith.constant 0 : index
    %c0_15 = arith.constant 0 : index
    %34 = vector.load %arg5[%c0_13, %c0_14, %c0_15] : memref<1x8x16xf32, #tpu.memory_space<vmem>>, vector<1x8x16xf32>
    tpu.vector_store %arg5[%c0_13, %c0_14, %c0_15], %33 {strides = array<i32>} : memref<1x8x16xf32, #tpu.memory_space<vmem>>, vector<1x8x16xf32>,
    return
  }
  func.func @transform_0(%arg0: i32) -> (i32, i32) {
    %c0_i32 = arith.constant 0 : i32
    %c0_i32_0 = arith.constant 0 : i32
    return %arg0, %c0_i32 : i32, i32
  }
  func.func @transform_1(%arg0: i32) -> (i32, i32) {
    %c0_i32 = arith.constant 0 : i32
    %c0_i32_0 = arith.constant 0 : i32
    %c0_i32_1 = arith.constant 0 : i32
    return %c0_i32, %c0_i32_0 : i32, i32
  }
  func.func @transform_2(%arg0: i32) -> (i32, i32) {
    %c0_i32 = arith.constant 0 : i32
    %c0_i32_0 = arith.constant 0 : i32
    %c0_i32_1 = arith.constant 0 : i32
    return %c0_i32, %c0_i32_0 : i32, i32
  }
  func.func @transform_3(%arg0: i32) -> (i32, i32) {
    %c0_i32 = arith.constant 0 : i32
    %c0_i32_0 = arith.constant 0 : i32
    return %arg0, %c0_i32 : i32, i32
  }
  func.func @transform_4(%arg0: i32) -> (i32, i32, i32) {
    %c0_i32 = arith.constant 0 : i32
    %c0_i32_0 = arith.constant 0 : i32
    %c0_i32_1 = arith.constant 0 : i32
    return %arg0, %c0_i32, %c0_i32_0 : i32, i32, i32
  }
}

</mosaic_0001>

<bundles_post_ra>
// kernel: tpu_custom_call.1
= control target key start
LH: loop header
LB: loop body
LE: loop exit
PB: predicated region body
PF: predicated region fallthrough
CT: control target
= control target key end

     0   :  { %vm90_vm0 = vcmask 1043456   ;;  %vm41_vm1 = vcmask 31744   ;;  %s775_s0 = inlined_call_operand.vmem [shape: f32[128,4], index: 0, kind: input, shape index: {}]   ;;  %s776_s1 = inlined_call_operand.vmem [shape: f32[4,16], index: 1, kind: input, shape index: {}]   ;;  %s777_s2 = inlined_call_operand.vmem [shape: f32[1,16], index: 2, kind: input, shape index: {}]   ;;  %s778_s3 = inlined_call_operand.vmem [shape: f32[128,16], index: 3, kind: output, shape index: {0}]   ;;  %s779_s4 = inlined_call_operand.hbm [shape: f32[1,8,16], index: 4, kind: output, shape index: {1}]  }
   0x1   :  { %v33_v0 = vld [vmem:[%s776_s1] sm:$0xf]  ;;  %v18_v2 = vld [vmem:[%s775_s0 + $0x8] sm:$0xff]  ;;  %v19_v3 = vld [vmem:[%s775_s0 + $0x10] sm:$0xff] }
   0x2   :  { %v17_v1 = vld [vmem:[%s775_s0] sm:$0xff]  ;;  %487 = vmatprep.subr.msk.mxu0 %vm90_vm0, %v33_v0  ;;  %513 = vmatprep.subr.msk.mxu1 %vm90_vm0, %v33_v0  ;;  %v26_v5 = vld [vmem:[%s775_s0 + $0x48] sm:$0xff]  ;;  %v27_v6 = vld [vmem:[%s775_s0 + $0x50] sm:$0xff] }
   0x3   :  { %489 = vmatprep.mubr.msk.f32.mxu0 %vm41_vm1, %v17_v1  ;;  %488 = vmatpush3.msk.msra.mxu0 %vm90_vm0, %v33_v0  ;;  %v25_v4 = vld [vmem:[%s775_s0 + $0x40] sm:$0xff]  ;;  %v20_v7 = vld [vmem:[%s775_s0 + $0x18] sm:$0xff] }
   0x4   :  { %490 = vmatmul.mubr.msk.f32.vlgmr.msra.gmra.mrb[0].mxu0 %vm41_vm1, %v18_v2  ;;  %514 = vmatpush3.msk.msra.mxu1 %vm90_vm0, %v33_v0  ;;  %v21_v8 = vld [vmem:[%s775_s0 + $0x20] sm:$0xff] }
   0x5   :  { %492 = vmatprep.mubr.msk.f32.mxu0 %vm41_vm1, %v19_v3  ;;  %501 = vmatprep.mubr.msk.f32.mxu1 %vm41_vm1, %v25_v4 }
   0x6   :  { %502 = vmatmul.mubr.msk.f32.vlgmr.msra.gmra.mrb[0].mxu1 %vm41_vm1, %v26_v5 }
   0x7   :  { %10 = vsyncpa [#allocation3], 0  ;;  %504 = vmatprep.mubr.msk.f32.mxu1 %vm41_vm1, %v27_v6  ;;  %v28_v9 = vld [vmem:[%s775_s0 + $0x58] sm:$0xff]  ;;  %v29_v10 = vld [vmem:[%s775_s0 + $0x60] sm:$0xff]  ;;  %vm255_vm2 = vcmask 130048  }
   0x8   :  { %493 = vmatmul.mubr.msk.f32.gmra.mrb[2].mxu0 %vm41_vm1, %v20_v7  ;;  %v22_v11 = vld [vmem:[%s775_s0 + $0x28] sm:$0xff]  ;;  %v23_v12 = vld [vmem:[%s775_s0 + $0x30] sm:$0xff]  ;;  %v24_v15 = vld [vmem:[%s775_s0 + $0x38] sm:$0xff] }
   0x9   :  { %495 = vmatprep.mubr.msk.f32.mxu0 %vm41_vm1, %v21_v8  ;;  %v30_v13 = vld [vmem:[%s775_s0 + $0x68] sm:$0xff]  ;;  %v31_v14 = vld [vmem:[%s775_s0 + $0x70] sm:$0xff]  ;;  %v32_v16 = vld [vmem:[%s775_s0 + $0x78] sm:$0xff] }
   0xa   :  { %505 = vmatmul.mubr.msk.f32.gmra.mrb[2].mxu1 %vm41_vm1, %v28_v9  ;;  %v636_v17 = vld [vmem:[%s777_s2] ss:$0 sm:$0xff] }
   0xb   :  { %507 = vmatprep.mubr.msk.f32.mxu1 %vm41_vm1, %v29_v10 }
   0xc   :  { %496 = vmatmul.mubr.msk.f32.gmra.mrb[4].mxu0 %vm41_vm1, %v22_v11 }
   0xd   :  { %498 = vmatprep.mubr.msk.f32.mxu0 %vm41_vm1, %v23_v12 }
   0xe   :  { %508 = vmatmul.mubr.msk.f32.gmra.mrb[4].mxu1 %vm41_vm1, %v30_v13 }
   0xf   :  { %510 = vmatprep.mubr.msk.f32.mxu1 %vm41_vm1, %v31_v14 }
  0x10   :  { %499 = vmatmul.mubr.msk.f32.gmra.mrb[6].mxu0 %vm41_vm1, %v24_v15 }
  0x12   :  { %511 = vmatmul.mubr.msk.f32.gmra.mrb[6].mxu1 %vm41_vm1, %v32_v16 }
  0xd7   :  { %v491_v18 = vpop.f32.mrb[0].mxu0 }
  0xd8   :  { %v166_v19 = vadd.f32 %v491_v18, %v636_v17  ;;  %v160_v20 = vpop.f32.mrb[1].mxu0 }
  0xd9   :  { %v161_v21 = vadd.f32 %v636_v17, %v160_v20  ;;  %v503_v22 = vpop.f32.mrb[0].mxu1 }
  0xda   :  { %v240_v23 = vmax.f32 %v166_v19, 0.0  ;;  %v206_v24 = vadd.f32 %v503_v22, %v636_v17  ;;  %v200_v25 = vpop.f32.mrb[1].mxu1 }
  0xdb   :  { %v239_v26 = vmax.f32 %v161_v21, 0.0  ;;  %v494_v27 = vpop.f32.mrb[2].mxu0  ;;  %v201_v28 = vadd.f32 %v636_v17, %v200_v25 }
  0xdc   :  { %257 = vst.msk [vmem:[%s778_s3 + $0x8] sm:$0xff] %vm255_vm2, %v240_v23  ;;  %v340_v29 = vsel %vm255_vm2, %v240_v23, 0.0  ;;  %v377_v30 = vmul.f32 %v240_v23, %v240_v23  ;;  %v176_v31 = vadd.f32 %v494_v27, %v636_v17  ;;  %v170_v32 = vpop.f32.mrb[3].mxu0  ;;  %v648_v33 = vmax.f32 %v206_v24, 0.0 }
  0xdd   :  { %256 = vst.msk [vmem:[%s778_s3] sm:$0xff] %vm255_vm2, %v239_v26  ;;  %v339_v34 = vsel %vm255_vm2, %v239_v26, 0.0  ;;  %v376_v35 = vmul.f32 %v239_v26, %v239_v26  ;;  %v171_v36 = vadd.f32 %v636_v17, %v170_v32  ;;  %v656_v37 = vmax.f32 %v201_v28, 0.0  ;;  %v506_v38 = vpop.f32.mrb[2].mxu1 }
  0xde   :  { %v393_v39 = vsel %vm255_vm2, %v377_v30, 0.0  ;;  %v341_v40 = vadd.f32 %v340_v29, %v339_v34  ;;  %v242_v41 = vmax.f32 %v176_v31, 0.0  ;;  %265 = vst.msk [vmem:[%s778_s3 + $0x48] sm:$0xff] %vm255_vm2, %v648_v33  ;;  %v210_v42 = vpop.f32.mrb[3].mxu1  ;;  %v216_v62 = vadd.f32 %v506_v38, %v636_v17 }
  0xdf   :  { %v392_v43 = vsel %vm255_vm2, %v376_v35, 0.0  ;;  %v241_v44 = vmax.f32 %v171_v36, 0.0  ;;  %v497_v45 = vpop.f32.mrb[4].mxu0  ;;  %264 = vst.msk [vmem:[%s778_s3 + $0x40] sm:$0xff] %vm255_vm2, %v656_v37  ;;  %v211_v3 = vadd.f32 %v636_v17, %v210_v42  ;;  %v384_v12 = vmul.f32 %v656_v37, %v656_v37 }
  0xe0   :  { %v394_v46 = vadd.f32 %v393_v39, %v392_v43  ;;  %259 = vst.msk [vmem:[%s778_s3 + $0x18] sm:$0xff] %vm255_vm2, %v242_v41  ;;  %v379_v47 = vmul.f32 %v242_v41, %v242_v41  ;;  %v186_v48 = vadd.f32 %v497_v45, %v636_v17  ;;  %v180_v49 = vpop.f32.mrb[5].mxu0  ;;  %v344_v54 = vsel %vm255_vm2, %v242_v41, 0.0 }
  0xe1   :  { %258 = vst.msk [vmem:[%s778_s3 + $0x10] sm:$0xff] %vm255_vm2, %v241_v44  ;;  %v342_v50 = vsel %vm255_vm2, %v241_v44, 0.0  ;;  %v378_v51 = vmul.f32 %v241_v44, %v241_v44  ;;  %v181_v52 = vadd.f32 %v636_v17, %v180_v49  ;;  %v509_v53 = vpop.f32.mrb[4].mxu1  ;;  %v250_v18 = vmax.f32 %v216_v62, 0.0 }
  0xe2   :  { %v343_v55 = vadd.f32 %v342_v50, %v341_v40  ;;  %v244_v56 = vmax.f32 %v186_v48, 0.0  ;;  %v220_v57 = vpop.f32.mrb[5].mxu1  ;;  %v397_v58 = vsel %vm255_vm2, %v379_v47, 0.0  ;;  %v249_v21 = vmax.f32 %v211_v3, 0.0 }
  0xe3   :  { %v395_v59 = vsel %vm255_vm2, %v378_v51, 0.0  ;;  %v243_v60 = vmax.f32 %v181_v52, 0.0  ;;  %v500_v61 = vpop.f32.mrb[6].mxu0  ;;  %v226_v22 = vadd.f32 %v509_v53, %v636_v17  ;;  %267 = vst.msk [vmem:[%s778_s3 + $0x58] sm:$0xff] %vm255_vm2, %v250_v18  ;;  %v385_v29 = vmul.f32 %v648_v33, %v648_v33 }
  0xe4   :  { %v396_v63 = vadd.f32 %v395_v59, %v394_v46  ;;  %261 = vst.msk [vmem:[%s778_s3 + $0x28] sm:$0xff] %vm255_vm2, %v244_v56  ;;  %v381_v0 = vmul.f32 %v244_v56, %v244_v56  ;;  %v345_v1 = vadd.f32 %v344_v54, %v343_v55  ;;  %v190_v2 = vpop.f32.mrb[7].mxu0  ;;  %v196_v6 = vadd.f32 %v500_v61, %v636_v17 }
  0xe5   :  { %260 = vst.msk [vmem:[%s778_s3 + $0x20] sm:$0xff] %vm255_vm2, %v243_v60  ;;  %v346_v4 = vsel %vm255_vm2, %v243_v60, 0.0  ;;  %v380_v5 = vmul.f32 %v243_v60, %v243_v60  ;;  %v191_v7 = vadd.f32 %v636_v17, %v190_v2  ;;  %v512_v8 = vpop.f32.mrb[6].mxu1  ;;  %v348_v9 = vsel %vm255_vm2, %v244_v56, 0.0  ;;  %266 = vst.msk [vmem:[%s778_s3 + $0x50] sm:$0xff] %vm255_vm2, %v249_v21 }
  0xe6   :  { %v347_v10 = vadd.f32 %v346_v4, %v345_v1  ;;  %v398_v11 = vadd.f32 %v397_v58, %v396_v63  ;;  %v230_v13 = vpop.f32.mrb[7].mxu1  ;;  %v246_v15 = vmax.f32 %v196_v6, 0.0  ;;  %v401_v23 = vsel %vm255_vm2, %v381_v0, 0.0 }
  0xe7   :  { %v399_v14 = vsel %vm255_vm2, %v380_v5, 0.0  ;;  %v245_v16 = vmax.f32 %v191_v7, 0.0  ;;  %v354_v32 = vsel %vm255_vm2, %v656_v37, 0.0  ;;  %v407_v34 = vsel %vm255_vm2, %v384_v12, 0.0 }
  0xe8   :  { %v400_v19 = vadd.f32 %v399_v14, %v398_v11  ;;  %v349_v20 = vadd.f32 %v348_v9, %v347_v10  ;;  %263 = vst.msk [vmem:[%s778_s3 + $0x38] sm:$0xff] %vm255_vm2, %v246_v15  ;;  %v383_v24 = vmul.f32 %v246_v15, %v246_v15  ;;  %v352_v30 = vsel %vm255_vm2, %v246_v15, 0.0 }
  0xe9   :  { %262 = vst.msk [vmem:[%s778_s3 + $0x30] sm:$0xff] %vm255_vm2, %v245_v16  ;;  %v350_v25 = vsel %vm255_vm2, %v245_v16, 0.0  ;;  %v382_v26 = vmul.f32 %v245_v16, %v245_v16  ;;  %v252_v39 = vmax.f32 %v226_v22, 0.0  ;;  %v386_v40 = vmul.f32 %v249_v21, %v249_v21 }
  0xea   :  { %v351_v27 = vadd.f32 %v350_v25, %v349_v20  ;;  %v402_v28 = vadd.f32 %v401_v23, %v400_v19  ;;  %v405_v35 = vsel %vm255_vm2, %v383_v24, 0.0  ;;  %v221_v41 = vadd.f32 %v636_v17, %v220_v57 }
  0xeb   :  { %v403_v31 = vsel %vm255_vm2, %v382_v26, 0.0  ;;  %v236_v42 = vadd.f32 %v512_v8, %v636_v17  ;;  %v231_v43 = vadd.f32 %v636_v17, %v230_v13  ;;  %v356_v44 = vsel %vm255_vm2, %v648_v33, 0.0  ;;  %269 = vst.msk [vmem:[%s778_s3 + $0x68] sm:$0xff] %vm255_vm2, %v252_v39 }
  0xec   :  { %v404_v36 = vadd.f32 %v403_v31, %v402_v28  ;;  %v353_v38 = vadd.f32 %v352_v30, %v351_v27  ;;  %v358_v37 = vsel %vm255_vm2, %v249_v21, 0.0  ;;  %v251_v47 = vmax.f32 %v221_v41, 0.0 }
  0xed   :  { %v254_v48 = vmax.f32 %v236_v42, 0.0  ;;  %v253_v49 = vmax.f32 %v231_v43, 0.0  ;;  %v409_v52 = vsel %vm255_vm2, %v385_v29, 0.0  ;;  %v387_v17 = vmul.f32 %v250_v18, %v250_v18 }
  0xee   :  { %v355_v45 = vadd.f32 %v354_v32, %v353_v38  ;;  %v406_v46 = vadd.f32 %v405_v35, %v404_v36  ;;  %v411_v53 = vsel %vm255_vm2, %v386_v40, 0.0  ;;  %268 = vst.msk [vmem:[%s778_s3 + $0x60] sm:$0xff] %vm255_vm2, %v251_v47  ;;  %v388_v33 = vmul.f32 %v251_v47, %v251_v47 }
  0xef   :  { %271 = vst.msk [vmem:[%s778_s3 + $0x78] sm:$0xff] %vm255_vm2, %v254_v48  ;;  %270 = vst.msk [vmem:[%s778_s3 + $0x70] sm:$0xff] %vm255_vm2, %v253_v49  ;;  %v360_v56 = vsel %vm255_vm2, %v250_v18, 0.0  ;;  %v362_v57 = vsel %vm255_vm2, %v251_v47, 0.0  ;;  %v413_v60 = vsel %vm255_vm2, %v387_v17, 0.0  ;;  %v389_v61 = vmul.f32 %v252_v39, %v252_v39  ;;  %s540_s3 = smov [#allocation2]  }
  0xf0   :  { %v408_v50 = vadd.f32 %v407_v34, %v406_v46  ;;  %v357_v51 = vadd.f32 %v356_v44, %v355_v45  ;;  %v415_v62 = vsel %vm255_vm2, %v388_v33, 0.0  ;;  %v390_v63 = vmul.f32 %v253_v49, %v253_v49  ;;  %s442_s24 = sshll.u32 %s540_s3, 4  ;;  %s443_s24 = int_to_ptr.vmem [resolvable:$true] %s442_s24 }
  0xf1   :  { %v364_v2 = vsel %vm255_vm2, %v252_v39, 0.0  ;;  %v366_v3 = vsel %vm255_vm2, %v253_v49, 0.0  ;;  %v417_v6 = vsel %vm255_vm2, %v389_v61, 0.0  ;;  %v391_v7 = vmul.f32 %v254_v48, %v254_v48  ;;  %s516_s25 = scalar_lea.vmem %s443_s24, 128  ;;  %p521_p1 = scmp.lt.s32.totalorder %s443_s24, %s443_s24 }
  0xf2   :  { %v359_v54 = vadd.f32 %v358_v37, %v357_v51  ;;  %v410_v55 = vadd.f32 %v409_v52, %v408_v50  ;;  %v419_v8 = vsel %vm255_vm2, %v390_v63, 0.0  ;;  %v368_v11 = vsel %vm255_vm2, %v254_v48, 0.0  ;;  %p517_p0 = scmp.ne.s32.totalorder %s443_s24, %s516_s25  ;;  %p522_p2 = scmp.lt.s32.totalorder %s516_s25, %s516_s25 }
  0xf3   :  { %v421_v14 = vsel %vm255_vm2, %v391_v7, 0.0  ;;  %v273_v20 = vlaneseq }
  0xf4   :  { %v412_v58 = vadd.f32 %v411_v53, %v410_v55  ;;  %v361_v59 = vadd.f32 %v360_v56, %v359_v54  ;;  %p523_p3 = por %p522_p2, %p521_p1 }
  0xf5   :  { %v274_v25 = vshrl.u32 %v273_v20, 7 }
  0xf6   :  { %v363_v0 = vadd.f32 %v362_v57, %v361_v59  ;;  %v414_v1 = vadd.f32 %v413_v60, %v412_v58  ;;  %p524_p4 = pnand %p523_p3, %p517_p0 }
  0xf7   :  { %vm430_vm3 = vcmp.eq.s32.totalorder %v274_v25, 1  ;;  %vm429_vm4 = vcmp.eq.s32.totalorder %v274_v25, 0 }
  0xf8   :  { %v416_v4 = vadd.f32 %v415_v62, %v414_v1  ;;  %v365_v5 = vadd.f32 %v364_v2, %v363_v0 }
  0xfa   :  { %v367_v9 = vadd.f32 %v366_v3, %v365_v5  ;;  %v418_v10 = vadd.f32 %v417_v6, %v416_v4 }
  0xfc   :  { %v369_v12 = vadd.f32 %v368_v11, %v367_v9  ;;  %v420_v13 = vadd.f32 %v419_v8, %v418_v10 }
  0xfe   :  { %v370_v15 = vrot.slane %v369_v12, 4  ;;  %v422_v16 = vadd.f32 %v421_v14, %v420_v13 }
 0x100   :  { %v371_v18 = vadd.f32 %v370_v15, %v369_v12  ;;  %v423_v19 = vrot.slane %v422_v16, 4 }
 0x102   :  { %v372_v21 = vrot.slane %v371_v18, 2  ;;  %v424_v22 = vadd.f32 %v423_v19, %v422_v16 }
 0x104   :  { %v373_v23 = vadd.f32 %v372_v21, %v371_v18  ;;  %v425_v24 = vrot.slane %v424_v22, 2 }
 0x106   :  { %v426_v26 = vadd.f32 %v425_v24, %v424_v22  ;;  %v374_v27 = vrot.slane %v373_v23, 1 }
 0x108   :  { %v427_v28 = vrot.slane %v426_v26, 1  ;;  %v375_v30 = vadd.f32 %v374_v27, %v373_v23 }
 0x10a   :  { %v428_v29 = vadd.f32 %v427_v28, %v426_v26 }
 0x10c   :  { %v431_v31 = vsel %vm430_vm3, %v428_v29, 0.0 }
 0x10d   :  { %v432_v32 = vsel %vm429_vm4, %v375_v30, %v431_v31 }
 0x10e   :  { %433 = vst.msk [vmem:[#allocation2] sm:$0xff] %vm255_vm2, %v432_v32 }
 0x10f   :  { %527 = shalt.err (!%p524_p4)
}
 0x110   :  { %s528_s28 = scalar_lea.hbm %s779_s4, 128 }
 0x111   :  { %p529_p5 = scmp.ne.s32.totalorder %s779_s4, %s528_s28  ;;  %p532_p6 = scmp.lt.u32.totalorder %s528_s28, %s779_s4 }
 0x113   :  { %p534_p7 = pnand %p532_p6, %p529_p5 }
 0x115   :  { %537 = shalt.err (!%p534_p7)
}
 0x116   :  { %445 = dma.vmem_to_hbm [thread:$0]  %s443_s24, 128, %s779_s4, [#allocation3]  }
 0x117   :  { %538 = dma.done.wait [#allocation3], 128  }
 0x118   :  { %539 = vsyncadd [#allocation3], 4294967168 }
 0x119   :  { %451 = vsyncpa [#allocation3], 1 }

</bundles_post_ra>
